<compile_context>
chip_gen: v6e
topology: v6e:2x2x1
jax: 0.10.0
libtpu: 0.0.40
codegen_flags: <defaults>
</compile_context>

<pallas_src>
import functools

import jax
import jax.numpy as jnp
from jax.experimental import pallas as pl
from jax.experimental.pallas import tpu as pltpu

EPS = 1e-5


def _ln_withbias_kernel(x_ref, w_ref, b_ref, o_ref):
    x = x_ref[...].astype(jnp.float32)                  # (bt, C, T)
    inv_c = jnp.float32(1.0 / x.shape[1])
    mu = jnp.sum(x, axis=1, keepdims=True) * inv_c      # (bt, 1, T)
    xc = x - mu
    var = jnp.sum(xc * xc, axis=1, keepdims=True) * inv_c
    r = jax.lax.rsqrt(var + EPS)
    w = w_ref[...].astype(jnp.float32)                  # (1, C, 1)
    b = b_ref[...].astype(jnp.float32)                  # (1, C, 1)
    o_ref[...] = (xc * r * w + b).astype(o_ref.dtype)


def _ln_biasfree_kernel(x_ref, w_ref, o_ref):
    x = x_ref[...].astype(jnp.float32)                  # (bt, C, T)
    inv_c = jnp.float32(1.0 / x.shape[1])
    mu = jnp.sum(x, axis=1, keepdims=True) * inv_c
    xc = x - mu
    var = jnp.sum(xc * xc, axis=1, keepdims=True) * inv_c  # mean-centered variance
    r = jax.lax.rsqrt(var + EPS)
    w = w_ref[...].astype(jnp.float32)                  # (1, C, 1)
    # NOTE: BiasFree variant divides x (NOT x - mu) by sqrt(var + eps).
    o_ref[...] = (x * r * w).astype(o_ref.dtype)


def _pick_tiles(B, C, HW, target_bytes=2 << 20):
    """Return (b_tile, hw_tile).

    Small-HW path (HW <= 256): keep the full spatial extent on the lane axis and
    fold batch rows into the block (a (Bt, C, HW) slab of (B, C, HW) is fully
    contiguous in HBM -> one big DMA per grid step).
    Large-HW path: b_tile = 1, hw_tile is a multiple of 128 sized to
    ~target_bytes of f32 working set.
    Either way keep >= min(total, 4) grid blocks so both v7x TensorCores (and
    the double-buffer pipeline) have work.
    """
    c_pad = -(-C // 8) * 8                               # f32 sublane padding
    if HW <= 256:
        hw_pad = -(-HW // 128) * 128
        per_row = c_pad * hw_pad * 4                     # f32 bytes per batch row
        bt = max(1, min(B, target_bytes // max(1, per_row)))
        min_blocks = min(B, 4)
        bt = max(1, min(bt, B // min_blocks))            # cdiv(B, bt) >= min_blocks
        return int(bt), int(HW)

    hw_blocks = -(-HW // 128)
    t = max(128, (target_bytes // max(1, c_pad * 4)) // 128 * 128)
    t = min(t, hw_blocks * 128)
    while t > 128 and B * (-(-HW // t)) < 4:
        t = max(128, (t // 2) // 128 * 128)
    return 1, int(t)


@functools.partial(jax.jit, static_argnames=("layernorm_type",))
def layernorm3d(x, weight, bias, layernorm_type="WithBias"):
    """x: NCHW float array.  weight/bias: (C,)."""
    B, C, H, W = x.shape
    HW = H * W
    itemsize = jnp.dtype(x.dtype).itemsize

    # Free views: no data movement on either side of the kernel.
    x3 = x.reshape(B, C, HW)
    w3 = weight.reshape(1, C, 1)
    b3 = bias.reshape(1, C, 1)

    bt, hw_tile = _pick_tiles(B, C, HW)
    grid = (pl.cdiv(B, bt), pl.cdiv(HW, hw_tile))

    x_spec = pl.BlockSpec((bt, C, hw_tile), lambda i, j: (i, 0, j))
    p_spec = pl.BlockSpec((1, C, 1), lambda i, j: (0, 0, 0))

    # VMEM budget: 2x-in + 2x-out blocks in x.dtype (double buffering) plus ~3
    # full-block f32 temporaries (cast / centered copy), with sublane and lane
    # padding included.  Capped at 40 MiB: safe on v7x (64 MiB physical) while
    # leaving pipeline headroom everywhere.
    lane_tile = -(-hw_tile // 128) * 128
    sub_in = max(8, 32 // itemsize)                       # 8 for f32, 16 for bf16
    c_pad_in = -(-C // sub_in) * sub_in
    c_pad32 = -(-C // 8) * 8
    blk_io = bt * c_pad_in * lane_tile * itemsize
    blk_f32 = bt * c_pad32 * lane_tile * 4
    param_bytes = 2 * c_pad32 * 128 * 4
    vmem_needed = 4 * blk_io + 3 * blk_f32 + param_bytes + (1 << 20)
    vmem_limit = int(min(40 << 20, max(8 << 20, vmem_needed)))

    cost = pl.CostEstimate(
        flops=10 * B * C * HW,
        transcendentals=B * HW,                           # one rsqrt per column
        bytes_accessed=2 * B * C * HW * itemsize + 2 * C * itemsize,
    )

    cparams = pltpu.CompilerParams(
        dimension_semantics=("parallel", "parallel"),
        vmem_limit_bytes=vmem_limit,
    )

    if layernorm_type == "BiasFree":
        out3 = pl.pallas_call(
            _ln_biasfree_kernel,
            out_shape=jax.ShapeDtypeStruct((B, C, HW), x.dtype),
            grid_spec=pltpu.PrefetchScalarGridSpec(
                num_scalar_prefetch=0,
                grid=grid,
                in_specs=[x_spec, p_spec],
                out_specs=x_spec,
            ),
            compiler_params=cparams,
            cost_estimate=cost,
        )(x3, w3)
    else:
        out3 = pl.pallas_call(
            _ln_withbias_kernel,
            out_shape=jax.ShapeDtypeStruct((B, C, HW), x.dtype),
            grid_spec=pltpu.PrefetchScalarGridSpec(
                num_scalar_prefetch=0,
                grid=grid,
                in_specs=[x_spec, p_spec, p_spec],
                out_specs=x_spec,
            ),
            compiler_params=cparams,
            cost_estimate=cost,
        )(x3, w3, b3)

    return out3.reshape(B, C, H, W)


def _reference(x, weight, bias, layernorm_type):
    B, C, H, W = x.shape
    x3 = jnp.transpose(x, (0, 2, 3, 1)).reshape(B, H * W, C).astype(jnp.float32)
    mu = jnp.mean(x3, axis=-1, keepdims=True)
    var = jnp.mean((x3 - mu) ** 2, axis=-1, keepdims=True)
    wf = weight.astype(jnp.float32)
    bf = bias.astype(jnp.float32)
    if layernorm_type == "BiasFree":
        y = x3 / jnp.sqrt(var + EPS) * wf
    else:
        y = (x3 - mu) / jnp.sqrt(var + EPS) * wf + bf
    y = y.astype(x.dtype)
    return jnp.transpose(y.reshape(B, H, W, C), (0, 3, 1, 2))


if __name__ == "__main__":
    key = jax.random.PRNGKey(0)

    # --- Primary shape (module-consistent): small-HW / B-folded path. ---
    B, C, H, W = 2, 4, 16, 16
    k0, k1, k2 = jax.random.split(key, 3)
    x = jax.random.normal(k0, (B, C, H, W), dtype=jnp.float32)
    weight = jnp.ones((C,), dtype=jnp.float32)      # nn.Parameter(torch.ones(dim))
    bias = jnp.zeros((C,), dtype=jnp.float32)       # nn.Parameter(torch.zeros(dim))

    out = layernorm3d(x, weight, bias, layernorm_type="WithBias")
    jax.block_until_ready(out)
    ref = _reference(x, weight, bias, "WithBias")
    assert out.shape == (B, C, H, W)
    assert jnp.allclose(out, ref, atol=1e-5, rtol=1e-5)

    out_bf = layernorm3d(x, weight, bias, layernorm_type="BiasFree")
    jax.block_until_ready(out_bf)
    ref_bf = _reference(x, weight, bias, "BiasFree")
    assert jnp.allclose(out_bf, ref_bf, atol=1e-5, rtol=1e-5)

    # --- Non-128-multiple spatial extent (full-extent lane tile), random affine. ---
    B2, C2, H2, W2 = 1, 32, 10, 12
    x2 = jax.random.normal(k1, (B2, C2, H2, W2), dtype=jnp.float32)
    w2 = jax.random.normal(jax.random.PRNGKey(1), (C2,), dtype=jnp.float32)
    b2 = jax.random.normal(jax.random.PRNGKey(2), (C2,), dtype=jnp.float32)
    out2 = layernorm3d(x2, w2, b2, layernorm_type="WithBias")
    jax.block_until_ready(out2)
    ref2 = _reference(x2, w2, b2, "WithBias")
    assert jnp.allclose(out2, ref2, atol=1e-4, rtol=1e-4)

    # --- Large-HW path with a partial last lane tile (HW = 576, tile = 128). ---
    B3, C3, H3, W3 = 1, 8, 24, 24
    x3_in = jax.random.normal(k2, (B3, C3, H3, W3), dtype=jnp.float32)
    w3p = jax.random.normal(jax.random.PRNGKey(3), (C3,), dtype=jnp.float32)
    b3p = jax.random.normal(jax.random.PRNGKey(4), (C3,), dtype=jnp.float32)
    out3 = layernorm3d(x3_in, w3p, b3p, layernorm_type="WithBias")
    jax.block_until_ready(out3)
    ref3 = _reference(x3_in, w3p, b3p, "WithBias")
    assert jnp.allclose(out3, ref3, atol=1e-4, rtol=1e-4)

    # --- bf16 input: f32 accumulation inside the kernel, bf16 output. ---
    xb = x.astype(jnp.bfloat16)
    outb = layernorm3d(xb, weight, bias, layernorm_type="WithBias")
    jax.block_until_ready(outb)
    refb = _reference(xb, weight, bias, "WithBias")
    assert jnp.allclose(outb.astype(jnp.float32), refb.astype(jnp.float32),
                        atol=3e-2, rtol=3e-2)

    print("KERNEL_OK")
</pallas_src>

<mosaic_0001>
module attributes {stable_mosaic.version = 11 : i64} {
  func.func @_ln_withbias_kernel(%arg0: i32, %arg1: i32, %arg2: memref<1x4x256xf32, #tpu.memory_space<vmem>>, %arg3: memref<1x4x1xf32, #tpu.memory_space<vmem>>, %arg4: memref<1x4x1xf32, #tpu.memory_space<vmem>>, %arg5: memref<1x4x256xf32, #tpu.memory_space<vmem>>) attributes {dimension_semantics = [#tpu.dimension_semantics<parallel>, #tpu.dimension_semantics<parallel>], iteration_bounds = array<i64: 2, 1>, scalar_prefetch = 0 : i64, scratch_operands = 0 : i64, tpu.core_type = #tpu.core_type<tc>, window_params = [{transform_indices = @transform_0, window_bounds = array<i64: 1, 4, 256>}, {pipeline_mode = #tpu.pipeline_mode<synchronous>, transform_indices = @transform_1, window_bounds = array<i64: 1, 4, 1>}, {pipeline_mode = #tpu.pipeline_mode<synchronous>, transform_indices = @transform_2, window_bounds = array<i64: 1, 4, 1>}, {transform_indices = @transform_3, window_bounds = array<i64: 1, 4, 256>}]} {
    %c0 = arith.constant 0 : index
    %c0_0 = arith.constant 0 : index
    %c0_1 = arith.constant 0 : index
    %0 = vector.load %arg2[%c0, %c0_0, %c0_1] : memref<1x4x256xf32, #tpu.memory_space<vmem>>, vector<1x4x256xf32>
    %cst = arith.constant dense<0.000000e+00> : vector<1x256xf32>
    %1 = vector.multi_reduction <add>, %0, %cst [1] : vector<1x4x256xf32> to vector<1x256xf32>
    %2 = vector.shape_cast %1 : vector<1x256xf32> to vector<1x1x256xf32>
    %cst_2 = arith.constant 2.500000e-01 : f32
    %3 = vector.broadcast %cst_2 : f32 to vector<1x1x256xf32>
    %4 = arith.mulf %2, %3 : vector<1x1x256xf32>
    %5 = vector.broadcast %4 : vector<1x1x256xf32> to vector<1x4x256xf32>
    %6 = arith.subf %0, %5 : vector<1x4x256xf32>
    %7 = arith.mulf %6, %6 : vector<1x4x256xf32>
    %cst_3 = arith.constant dense<0.000000e+00> : vector<1x256xf32>
    %8 = vector.multi_reduction <add>, %7, %cst_3 [1] : vector<1x4x256xf32> to vector<1x256xf32>
    %9 = vector.shape_cast %8 : vector<1x256xf32> to vector<1x1x256xf32>
    %cst_4 = arith.constant 2.500000e-01 : f32
    %10 = vector.broadcast %cst_4 : f32 to vector<1x1x256xf32>
    %11 = arith.mulf %9, %10 : vector<1x1x256xf32>
    %cst_5 = arith.constant 9.99999974E-6 : f32
    %12 = vector.broadcast %cst_5 : f32 to vector<1x1x256xf32>
    %13 = arith.addf %11, %12 : vector<1x1x256xf32>
    %14 = math.rsqrt %13 : vector<1x1x256xf32>
    %c0_6 = arith.constant 0 : index
    %c0_7 = arith.constant 0 : index
    %c0_8 = arith.constant 0 : index
    %15 = vector.load %arg3[%c0_6, %c0_7, %c0_8] : memref<1x4x1xf32, #tpu.memory_space<vmem>>, vector<1x4x1xf32>
    %c0_9 = arith.constant 0 : index
    %c0_10 = arith.constant 0 : index
    %c0_11 = arith.constant 0 : index
    %16 = vector.load %arg4[%c0_9, %c0_10, %c0_11] : memref<1x4x1xf32, #tpu.memory_space<vmem>>, vector<1x4x1xf32>
    %17 = vector.broadcast %14 : vector<1x1x256xf32> to vector<1x4x256xf32>
    %18 = arith.mulf %6, %17 : vector<1x4x256xf32>
    %19 = vector.broadcast %15 : vector<1x4x1xf32> to vector<1x4x256xf32>
    %20 = arith.mulf %18, %19 : vector<1x4x256xf32>
    %21 = vector.broadcast %16 : vector<1x4x1xf32> to vector<1x4x256xf32>
    %22 = arith.addf %20, %21 : vector<1x4x256xf32>
    %c0_12 = arith.constant 0 : index
    %c0_13 = arith.constant 0 : index
    %c0_14 = arith.constant 0 : index
    %23 = vector.load %arg5[%c0_12, %c0_13, %c0_14] : memref<1x4x256xf32, #tpu.memory_space<vmem>>, vector<1x4x256xf32>
    tpu.vector_store %arg5[%c0_12, %c0_13, %c0_14], %22 {strides = array<i32>} : memref<1x4x256xf32, #tpu.memory_space<vmem>>, vector<1x4x256xf32>,
    return
  }
  func.func @transform_0(%arg0: i32, %arg1: i32) -> (i32, i32, i32) {
    %c0_i32 = arith.constant 0 : i32
    %c0_i32_0 = arith.constant 0 : i32
    return %arg0, %c0_i32, %arg1 : i32, i32, i32
  }
  func.func @transform_1(%arg0: i32, %arg1: i32) -> (i32, i32, i32) {
    %c0_i32 = arith.constant 0 : i32
    %c0_i32_0 = arith.constant 0 : i32
    %c0_i32_1 = arith.constant 0 : i32
    %c0_i32_2 = arith.constant 0 : i32
    return %c0_i32, %c0_i32_0, %c0_i32_1 : i32, i32, i32
  }
  func.func @transform_2(%arg0: i32, %arg1: i32) -> (i32, i32, i32) {
    %c0_i32 = arith.constant 0 : i32
    %c0_i32_0 = arith.constant 0 : i32
    %c0_i32_1 = arith.constant 0 : i32
    %c0_i32_2 = arith.constant 0 : i32
    return %c0_i32, %c0_i32_0, %c0_i32_1 : i32, i32, i32
  }
  func.func @transform_3(%arg0: i32, %arg1: i32) -> (i32, i32, i32) {
    %c0_i32 = arith.constant 0 : i32
    %c0_i32_0 = arith.constant 0 : i32
    return %arg0, %c0_i32, %arg1 : i32, i32, i32
  }
}

</mosaic_0001>

<bundles_post_ra>
// kernel: layernorm3d.1
= control target key start
LH: loop header
LB: loop body
LE: loop exit
PB: predicated region body
PF: predicated region fallthrough
CT: control target
= control target key end

     0   :  { %s472_s12 = smov 0   ;;  %s474_s13 = smov 0   ;;  %s522_s0 = inlined_call_operand.vmem [shape: f32[2,4,256], index: 0, kind: input, shape index: {}]   ;;  %s523_s1 = inlined_call_operand.vmem [shape: f32[1,4,1], index: 1, kind: input, shape index: {}]   ;;  %s524_s2 = inlined_call_operand.vmem [shape: f32[1,4,1], index: 2, kind: input, shape index: {}]   ;;  %s525_s3 = inlined_call_operand.vmem [shape: f32[2,4,256], index: 3, kind: output, shape index: {}]  }
   0x1   :  { %s476_s14 = smov 0  }
   0x2 LB: > { %s25_s15 = sadd.s32 1, %s444_s13  ;;  %p385_p0 = scmp.ge.s32.totalorder %s448_s14, 1  ;;  %s448_s14 = sphi %s476_s14, %s13_s14   ;;  %s444_s13 = sphi %s474_s13, %s527_s13   ;;  %s440_s12 = sphi %s472_s12, %s526_s12  }
   0x3   : > { %p27_p1 = scmp.ge.s32.totalorder %s25_s15, 2  ;;  %p158_p2 = scmp.lt.s32.totalorder %s448_s14, 3 }
   0x5   : > { %s529_s15 = smov (%p27_p1, %s25_s15), 0  ;;  %p159_p3 = pnand %p385_p0, %p158_p2 }
   0x6   : > { %p191_p4 = scmp.lt.s32.totalorder (!%p159_p3), %s440_s12, 1 }
   0x7   : > { %162 = sbr.rel (%p159_p3) target bundleno = 147 (0x93), region = 32 }
   0xc   : > { %v260_v0 = vld [vmem:[%s523_s1] sm:$0xf]  ;;  %v450_v1 = vmov 0   ;;  %s531_s12 = smov (!%p191_p4, %s440_s12), 1  ;;  %vm214_vm0 = vcmask 1043456   ;;  %v274_v45 = vlaneseq }
   0xd   : > { %420 = vset.pattern.permute.xlu0 %v450_v1  ;;  %v261_v2 = vld [vmem:[%s524_s2] sm:$0xf]  ;;  %s392_s20 = sshll.u32 %s531_s12, 3  ;;  %v451_v43 = vmov 839922192  }
   0xe   : > { %269 = vperm.xlu0 %420, %v260_v0   ;;  %s198_s23 = scalar_lea.vmem %s522_s0, %s392_s20  ;;  %v272_v44 = vunpack.c.l.s4 %v451_v43  ;;  %v275_v48 = vshrl.u32 %v274_v45, 7  ;;  %s208_s26 = scalar_lea.vmem %s525_s3, %s392_s20 }
   0xf   : > { %v210_v3 = vld [vmem:[%s198_s23] sm:$0xff] }
  0x10   : > { %v212_v4 = vcombine.high %v210_v3, %v210_v3  ;;  %v215_v5 = vsel %vm214_vm0, %v210_v3, 0.0  ;;  %v273_v47 = vunpack.c.0.s8 %v272_v44 }
  0x11   : > { %v216_v7 = vrot.slane %v215_v5, 4 }
  0x12   : > { %282 = vperm.xlu0 %420, %v261_v2   ;;  %v222_v6 = vsel %vm214_vm0, %v212_v4, 0.0  ;;  %v276_v50 = vsub.s32 %v273_v47, %v275_v48 }
  0x13   : > { %v223_v8 = vrot.slane %v222_v6, 4  ;;  %v217_v9 = vadd.f32 %v216_v7, %v215_v5 }
  0x15   : > { %v224_v10 = vadd.f32 %v223_v8, %v222_v6  ;;  %v218_v11 = vrot.slane %v217_v9, 2 }
  0x17   : > { %v225_v12 = vrot.slane %v224_v10, 2  ;;  %v219_v13 = vadd.f32 %v218_v11, %v217_v9 }
  0x19   : > { %v226_v14 = vadd.f32 %v225_v12, %v224_v10  ;;  %v220_v15 = vrot.slane %v219_v13, 1 }
  0x1b   : > { %v227_v16 = vrot.slane %v226_v14, 1  ;;  %v221_v17 = vadd.f32 %v220_v15, %v219_v13 }
  0x1d   : > { %v228_v18 = vadd.f32 %v227_v16, %v226_v14  ;;  %v229_v19 = vmul.f32 0.25, %v221_v17 }
  0x1f   : > { %v230_v20 = vmul.f32 0.25, %v228_v18 }
  0x21   : > { %v233_v21 = vcombine.low %v229_v19, %v230_v20 }
  0x23   : > { %v235_v22 = vsub.f32 %v210_v3, %v233_v21 }
  0x25   : > { %v236_v23 = vmul.f32 %v235_v22, %v235_v22 }
  0x27   : > { %v238_v24 = vcombine.high %v236_v23, %v236_v23  ;;  %v240_v25 = vsel %vm214_vm0, %v236_v23, 0.0 }
  0x28   : > { %v241_v27 = vrot.slane %v240_v25, 4 }
  0x29   : > { %v247_v26 = vsel %vm214_vm0, %v238_v24, 0.0 }
  0x2a   : > { %v248_v28 = vrot.slane %v247_v26, 4  ;;  %v242_v29 = vadd.f32 %v241_v27, %v240_v25 }
  0x2c   : > { %v249_v30 = vadd.f32 %v248_v28, %v247_v26  ;;  %v243_v31 = vrot.slane %v242_v29, 2 }
  0x2e   : > { %v250_v32 = vrot.slane %v249_v30, 2  ;;  %v244_v33 = vadd.f32 %v243_v31, %v242_v29 }
  0x30   : > { %v251_v34 = vadd.f32 %v250_v32, %v249_v30  ;;  %v245_v35 = vrot.slane %v244_v33, 1 }
  0x32   : > { %v252_v36 = vrot.slane %v251_v34, 1  ;;  %v246_v37 = vadd.f32 %v245_v35, %v244_v33 }
  0x34   : > { %v253_v38 = vadd.f32 %v252_v36, %v251_v34  ;;  %v254_v39 = vmul.f32 0.25, %v246_v37 }
  0x36   : > { %v255_v40 = vmul.f32 0.25, %v253_v38  ;;  %v256_v41 = vadd.f32 1e-05, %v254_v39 }
  0x38   : > { %v257_v42 = vadd.f32 1e-05, %v255_v40  ;;  %422 = vrsqrt.f32 %v256_v41 }
  0x3a   : > { %424 = vrsqrt.f32 %v257_v42 }
  0x45   : > { %v423_v46 = vpop.eup %422 }
  0x47   : > { %v425_v49 = vpop.eup %424 }
  0x48   : > { %v264_v51 = vcombine.low %v423_v46, %v425_v49 }
  0x4a   : > { %v266_v53 = vmul.f32 %v264_v51, %v235_v22 }
  0x89   : > { %v270_v52 = vpop.permute.xlu0 %269 }
  0x8a   : > { %v277_v54 = vrot.slane %v270_v52, %v276_v50 }
  0x8c   : > { %v279_v56 = vmul.f32 %v277_v54, %v266_v53 }
  0x8d   : > { %v283_v55 = vpop.permute.xlu0 %282 }
  0x8e   : > { %v290_v57 = vrot.slane %v283_v55, %v276_v50 }
  0x90   : > { %v292_v58 = vadd.f32 %v290_v57, %v279_v56 }
  0x92   : > { %293 = vst [vmem:[%s208_s26] sm:$0xff] %v292_v58 }
  0x93 PF: > { %s13_s14 = sadd.s32 1, %s448_s14   ;;  %s526_s12 = smov %s444_s13 }
  0x94   : > { %p10_p5 = scmp.ge.s32.totalorder %s13_s14, 4   ;;  %s527_s13 = smov %s529_s15 }
  0x96   :  { %12 = sbr.rel (!%p10_p5) target bundleno = 2 (0x2), region = 62 }

</bundles_post_ra>
